<compile_context>
chip_gen: v7x
topology: tpu7x:2x2x1
jax: 0.10.0
libtpu: 0.0.40
codegen_flags: <defaults>
</compile_context>

<pallas_src>
import jax
import jax.numpy as jnp
from jax.experimental import pallas as pl
from jax.experimental.pallas import tpu as pltpu


def _mlp_kernel(x1_ref, x2_ref,
                w1a_ref, w1b_ref, b1_ref,
                w2_ref, b2_ref,
                w3_ref, b3_ref,
                o_ref):
    # fc1 as a split GEMM (replaces cat([x1, x2]) @ w1): two MXU pushes
    # accumulated in f32, no cross-lane concat needed.
    h = jnp.dot(x1_ref[...], w1a_ref[...], preferred_element_type=jnp.float32)
    h = h + jnp.dot(x2_ref[...], w1b_ref[...], preferred_element_type=jnp.float32)
    h = jnp.maximum(h + b1_ref[...], 0.0)

    # fc2 + ReLU
    h = jnp.dot(h, w2_ref[...], preferred_element_type=jnp.float32) + b2_ref[...]
    h = jnp.maximum(h, 0.0)

    # fc3 + tanh (tanh -> EUP slot)
    h = jnp.dot(h, w3_ref[...], preferred_element_type=jnp.float32) + b3_ref[...]
    o_ref[...] = jnp.tanh(h).astype(o_ref.dtype)


def latent_for_dyn_mlp(x1, x2, params, *, max_batch_tile=512):
    """Pallas wrapper. x1: [B, ob_rep_dim], x2: [B, act_rep_dim]."""
    w1, b1, w2, b2, w3, b3 = params
    B = x1.shape[0]
    ob_dim = x1.shape[1]
    act_dim = x2.shape[1]
    out_dim = w3.shape[1]

    # Split fc1's weight so the kernel never concatenates along the lane axis.
    w1a = w1[:ob_dim, :]
    w1b = w1[ob_dim:, :]

    # Batch tile: multiple of 8 (f32 sublane), capped at max_batch_tile rows.
    tb = min(max_batch_tile, ((B + 7) // 8) * 8)
    tb = max(tb, 8)
    Bp = ((B + tb - 1) // tb) * tb
    if Bp != B:
        pad = Bp - B
        x1 = jnp.pad(x1, ((0, pad), (0, 0)))
        x2 = jnp.pad(x2, ((0, pad), (0, 0)))

    grid = (Bp // tb,)

    # Activations/outputs: tiled along batch.
    batch_spec = lambda feat: pl.BlockSpec((tb, feat), lambda i: (i, 0))
    # Weights/biases: whole array, constant block index -> VMEM-resident across
    # grid steps (no re-DMA per step).
    resident = lambda arr: pl.BlockSpec(arr.shape, lambda i: (0, 0))

    out = pl.pallas_call(
        _mlp_kernel,
        out_shape=jax.ShapeDtypeStruct((Bp, out_dim), jnp.float32),
        grid=grid,
        in_specs=[
            batch_spec(ob_dim), batch_spec(act_dim),
            resident(w1a), resident(w1b), resident(b1),
            resident(w2), resident(b2),
            resident(w3), resident(b3),
        ],
        out_specs=batch_spec(out_dim),
        compiler_params=pltpu.CompilerParams(
            dimension_semantics=("parallel",),
        ),
    )(x1, x2, w1a, w1b, b1, w2, b2, w3, b3)

    return out if Bp == B else out[:B]


def init_params(key, ob_rep_dim, act_rep_dim, hidden_dim):
    """Deterministic PyTorch-style (uniform +-1/sqrt(fan_in)) init.

    Weights stored as [in_dim, out_dim]; biases as [1, out_dim]."""
    def linear(key, in_dim, out_dim):
        kw, kb = jax.random.split(key)
        bound = 1.0 / jnp.sqrt(in_dim)
        w = jax.random.uniform(kw, (in_dim, out_dim), jnp.float32, -bound, bound)
        b = jax.random.uniform(kb, (1, out_dim), jnp.float32, -bound, bound)
        return w, b

    k1, k2, k3 = jax.random.split(key, 3)
    w1, b1 = linear(k1, ob_rep_dim + act_rep_dim, hidden_dim)
    w2, b2 = linear(k2, hidden_dim, hidden_dim)
    w3, b3 = linear(k3, hidden_dim, ob_rep_dim)
    return (w1, b1, w2, b2, w3, b3)


def reference(x1, x2, params):
    w1, b1, w2, b2, w3, b3 = params
    x = jnp.concatenate([x1, x2], axis=1)
    x = jnp.maximum(x @ w1 + b1, 0.0)
    x = jnp.maximum(x @ w2 + b2, 0.0)
    return jnp.tanh(x @ w3 + b3)


if __name__ == "__main__":
    # Small shapes consistent with the module's forward.
    batch, ob_rep_dim, act_rep_dim, hidden_dim = 8, 16, 8, 32

    key = jax.random.PRNGKey(0)
    kx1, kx2, kp = jax.random.split(key, 3)
    x1 = jax.random.normal(kx1, (batch, ob_rep_dim), jnp.float32)
    x2 = jax.random.normal(kx2, (batch, act_rep_dim), jnp.float32)
    params = init_params(kp, ob_rep_dim, act_rep_dim, hidden_dim)

    out = latent_for_dyn_mlp(x1, x2, params)
    out = jax.block_until_ready(out)

    ref = reference(x1, x2, params)
    assert out.shape == (batch, ob_rep_dim)
    assert jnp.allclose(out, ref, atol=1e-5, rtol=1e-5)

    # Batch that is not a multiple of 8 / the tile, to exercise padding+slice.
    xb1 = jax.random.normal(kx1, (37, ob_rep_dim), jnp.float32)
    xb2 = jax.random.normal(kx2, (37, act_rep_dim), jnp.float32)
    out2 = jax.block_until_ready(latent_for_dyn_mlp(xb1, xb2, params))
    assert out2.shape == (37, ob_rep_dim)
    assert jnp.allclose(out2, reference(xb1, xb2, params), atol=1e-5, rtol=1e-5)

    # Larger batch spanning several grid steps (multi-tile, "parallel" axis).
    xb1 = jax.random.normal(kx1, (1024 + 24, ob_rep_dim), jnp.float32)
    xb2 = jax.random.normal(kx2, (1024 + 24, act_rep_dim), jnp.float32)
    out3 = jax.block_until_ready(latent_for_dyn_mlp(xb1, xb2, params))
    assert jnp.allclose(out3, reference(xb1, xb2, params), atol=1e-5, rtol=1e-5)

    print("KERNEL_OK")
</pallas_src>

<mosaic_0001>
module attributes {stable_mosaic.version = 11 : i64} {
  func.func @_mlp_kernel(%arg0: i32, %arg1: memref<8x16xf32, #tpu.memory_space<vmem>>, %arg2: memref<8x8xf32, #tpu.memory_space<vmem>>, %arg3: memref<16x32xf32, #tpu.memory_space<vmem>>, %arg4: memref<8x32xf32, #tpu.memory_space<vmem>>, %arg5: memref<1x32xf32, #tpu.memory_space<vmem>>, %arg6: memref<32x32xf32, #tpu.memory_space<vmem>>, %arg7: memref<1x32xf32, #tpu.memory_space<vmem>>, %arg8: memref<32x16xf32, #tpu.memory_space<vmem>>, %arg9: memref<1x16xf32, #tpu.memory_space<vmem>>, %arg10: memref<8x16xf32, #tpu.memory_space<vmem>>) attributes {dimension_semantics = [#tpu.dimension_semantics<parallel>], iteration_bounds = array<i64: 1>, scalar_prefetch = 0 : i64, scratch_operands = 0 : i64, tpu.core_type = #tpu.core_type<tc>, window_params = [{transform_indices = @transform_0, window_bounds = array<i64: 8, 16>}, {transform_indices = @transform_1, window_bounds = array<i64: 8, 8>}, {pipeline_mode = #tpu.pipeline_mode<synchronous>, transform_indices = @transform_2, window_bounds = array<i64: 16, 32>}, {pipeline_mode = #tpu.pipeline_mode<synchronous>, transform_indices = @transform_3, window_bounds = array<i64: 8, 32>}, {pipeline_mode = #tpu.pipeline_mode<synchronous>, transform_indices = @transform_4, window_bounds = array<i64: 1, 32>}, {pipeline_mode = #tpu.pipeline_mode<synchronous>, transform_indices = @transform_5, window_bounds = array<i64: 32, 32>}, {pipeline_mode = #tpu.pipeline_mode<synchronous>, transform_indices = @transform_6, window_bounds = array<i64: 1, 32>}, {pipeline_mode = #tpu.pipeline_mode<synchronous>, transform_indices = @transform_7, window_bounds = array<i64: 32, 16>}, {pipeline_mode = #tpu.pipeline_mode<synchronous>, transform_indices = @transform_8, window_bounds = array<i64: 1, 16>}, {transform_indices = @transform_9, window_bounds = array<i64: 8, 16>}]} {
    %c0 = arith.constant 0 : index
    %c0_0 = arith.constant 0 : index
    %0 = vector.load %arg1[%c0, %c0_0] : memref<8x16xf32, #tpu.memory_space<vmem>>, vector<8x16xf32>
    %c0_1 = arith.constant 0 : index
    %c0_2 = arith.constant 0 : index
    %1 = vector.load %arg3[%c0_1, %c0_2] : memref<16x32xf32, #tpu.memory_space<vmem>>, vector<16x32xf32>
    %cst = arith.constant dense<0.000000e+00> : vector<8x32xf32>
    %2 = tpu.matmul %0, %1, %cst {dimension_numbers = #tpu.dot_dimension_numbers<[1], [0], [0], [1], [0, 0, 1, 1], [], []>} : vector<8x16xf32>, vector<16x32xf32>, vector<8x32xf32> -> vector<8x32xf32>
    %c0_3 = arith.constant 0 : index
    %c0_4 = arith.constant 0 : index
    %3 = vector.load %arg2[%c0_3, %c0_4] : memref<8x8xf32, #tpu.memory_space<vmem>>, vector<8x8xf32>
    %c0_5 = arith.constant 0 : index
    %c0_6 = arith.constant 0 : index
    %4 = vector.load %arg4[%c0_5, %c0_6] : memref<8x32xf32, #tpu.memory_space<vmem>>, vector<8x32xf32>
    %cst_7 = arith.constant dense<0.000000e+00> : vector<8x32xf32>
    %5 = tpu.matmul %3, %4, %cst_7 {dimension_numbers = #tpu.dot_dimension_numbers<[1], [0], [0], [1], [0, 0, 1, 1], [], []>} : vector<8x8xf32>, vector<8x32xf32>, vector<8x32xf32> -> vector<8x32xf32>
    %6 = arith.addf %2, %5 : vector<8x32xf32>
    %c0_8 = arith.constant 0 : index
    %c0_9 = arith.constant 0 : index
    %7 = vector.load %arg5[%c0_8, %c0_9] : memref<1x32xf32, #tpu.memory_space<vmem>>, vector<1x32xf32>
    %8 = vector.broadcast %7 : vector<1x32xf32> to vector<8x32xf32>
    %9 = arith.addf %6, %8 : vector<8x32xf32>
    %cst_10 = arith.constant 0.000000e+00 : f32
    %10 = vector.broadcast %cst_10 : f32 to vector<8x32xf32>
    %11 = arith.maximumf %9, %10 : vector<8x32xf32>
    %c0_11 = arith.constant 0 : index
    %c0_12 = arith.constant 0 : index
    %12 = vector.load %arg6[%c0_11, %c0_12] : memref<32x32xf32, #tpu.memory_space<vmem>>, vector<32x32xf32>
    %cst_13 = arith.constant dense<0.000000e+00> : vector<8x32xf32>
    %13 = tpu.matmul %11, %12, %cst_13 {dimension_numbers = #tpu.dot_dimension_numbers<[1], [0], [0], [1], [0, 0, 1, 1], [], []>} : vector<8x32xf32>, vector<32x32xf32>, vector<8x32xf32> -> vector<8x32xf32>
    %c0_14 = arith.constant 0 : index
    %c0_15 = arith.constant 0 : index
    %14 = vector.load %arg7[%c0_14, %c0_15] : memref<1x32xf32, #tpu.memory_space<vmem>>, vector<1x32xf32>
    %15 = vector.broadcast %14 : vector<1x32xf32> to vector<8x32xf32>
    %16 = arith.addf %13, %15 : vector<8x32xf32>
    %cst_16 = arith.constant 0.000000e+00 : f32
    %17 = vector.broadcast %cst_16 : f32 to vector<8x32xf32>
    %18 = arith.maximumf %16, %17 : vector<8x32xf32>
    %c0_17 = arith.constant 0 : index
    %c0_18 = arith.constant 0 : index
    %19 = vector.load %arg8[%c0_17, %c0_18] : memref<32x16xf32, #tpu.memory_space<vmem>>, vector<32x16xf32>
    %cst_19 = arith.constant dense<0.000000e+00> : vector<8x16xf32>
    %20 = tpu.matmul %18, %19, %cst_19 {dimension_numbers = #tpu.dot_dimension_numbers<[1], [0], [0], [1], [0, 0, 1, 1], [], []>} : vector<8x32xf32>, vector<32x16xf32>, vector<8x16xf32> -> vector<8x16xf32>
    %c0_20 = arith.constant 0 : index
    %c0_21 = arith.constant 0 : index
    %21 = vector.load %arg9[%c0_20, %c0_21] : memref<1x16xf32, #tpu.memory_space<vmem>>, vector<1x16xf32>
    %22 = vector.broadcast %21 : vector<1x16xf32> to vector<8x16xf32>
    %23 = arith.addf %20, %22 : vector<8x16xf32>
    %24 = math.tanh %23 : vector<8x16xf32>
    %c0_22 = arith.constant 0 : index
    %c0_23 = arith.constant 0 : index
    %25 = vector.load %arg10[%c0_22, %c0_23] : memref<8x16xf32, #tpu.memory_space<vmem>>, vector<8x16xf32>
    tpu.vector_store %arg10[%c0_22, %c0_23], %24 {strides = array<i32>} : memref<8x16xf32, #tpu.memory_space<vmem>>, vector<8x16xf32>,
    return
  }
  func.func @transform_0(%arg0: i32) -> (i32, i32) {
    %c0_i32 = arith.constant 0 : i32
    %c0_i32_0 = arith.constant 0 : i32
    return %arg0, %c0_i32 : i32, i32
  }
  func.func @transform_1(%arg0: i32) -> (i32, i32) {
    %c0_i32 = arith.constant 0 : i32
    %c0_i32_0 = arith.constant 0 : i32
    return %arg0, %c0_i32 : i32, i32
  }
  func.func @transform_2(%arg0: i32) -> (i32, i32) {
    %c0_i32 = arith.constant 0 : i32
    %c0_i32_0 = arith.constant 0 : i32
    %c0_i32_1 = arith.constant 0 : i32
    return %c0_i32, %c0_i32_0 : i32, i32
  }
  func.func @transform_3(%arg0: i32) -> (i32, i32) {
    %c0_i32 = arith.constant 0 : i32
    %c0_i32_0 = arith.constant 0 : i32
    %c0_i32_1 = arith.constant 0 : i32
    return %c0_i32, %c0_i32_0 : i32, i32
  }
  func.func @transform_4(%arg0: i32) -> (i32, i32) {
    %c0_i32 = arith.constant 0 : i32
    %c0_i32_0 = arith.constant 0 : i32
    %c0_i32_1 = arith.constant 0 : i32
    return %c0_i32, %c0_i32_0 : i32, i32
  }
  func.func @transform_5(%arg0: i32) -> (i32, i32) {
    %c0_i32 = arith.constant 0 : i32
    %c0_i32_0 = arith.constant 0 : i32
    %c0_i32_1 = arith.constant 0 : i32
    return %c0_i32, %c0_i32_0 : i32, i32
  }
  func.func @transform_6(%arg0: i32) -> (i32, i32) {
    %c0_i32 = arith.constant 0 : i32
    %c0_i32_0 = arith.constant 0 : i32
    %c0_i32_1 = arith.constant 0 : i32
    return %c0_i32, %c0_i32_0 : i32, i32
  }
  func.func @transform_7(%arg0: i32) -> (i32, i32) {
    %c0_i32 = arith.constant 0 : i32
    %c0_i32_0 = arith.constant 0 : i32
    %c0_i32_1 = arith.constant 0 : i32
    return %c0_i32, %c0_i32_0 : i32, i32
  }
  func.func @transform_8(%arg0: i32) -> (i32, i32) {
    %c0_i32 = arith.constant 0 : i32
    %c0_i32_0 = arith.constant 0 : i32
    %c0_i32_1 = arith.constant 0 : i32
    return %c0_i32, %c0_i32_0 : i32, i32
  }
  func.func @transform_9(%arg0: i32) -> (i32, i32) {
    %c0_i32 = arith.constant 0 : i32
    %c0_i32_0 = arith.constant 0 : i32
    return %arg0, %c0_i32 : i32, i32
  }
}

</mosaic_0001>

<bundles_post_ra>
// kernel: tpu_custom_call.1
= control target key start
LH: loop header
LB: loop body
LE: loop exit
PB: predicated region body
PF: predicated region fallthrough
CT: control target
= control target key end

     0   :  { %14 = vsyncpa [#allocation3], 0  ;;  %s698_s0 = inlined_call_operand.vmem [shape: f32[8,16], index: 0, kind: input, shape index: {}]   ;;  %s699_s1 = inlined_call_operand.hbm [shape: f32[8,8], index: 1, kind: input, shape index: {}]   ;;  %s700_s2 = inlined_call_operand.vmem [shape: f32[16,32], index: 2, kind: input, shape index: {}]   ;;  %s701_s3 = inlined_call_operand.hbm [shape: f32[8,32], index: 3, kind: input, shape index: {}]   ;;  %s702_s4 = inlined_call_operand.vmem [shape: f32[1,32], index: 4, kind: input, shape index: {}]   ;;  %s703_s5 = inlined_call_operand.vmem [shape: f32[32,32], index: 5, kind: input, shape index: {}]   ;;  %s704_s6 = inlined_call_operand.vmem [shape: f32[1,32], index: 6, kind: input, shape index: {}]   ;;  %s705_s7 = inlined_call_operand.vmem [shape: f32[32,16], index: 7, kind: input, shape index: {}]   ;;  %s706_s8 = inlined_call_operand.vmem [shape: f32[1,16], index: 8, kind: input, shape index: {}]   ;;  %s707_s9 = inlined_call_operand.hbm [shape: f32[8,16], index: 9, kind: output, shape index: {}]  }
   0x1   :  { %15 = vsyncpa [#allocation6], 0 }
   0x2   :  { %16 = vsyncpa [#allocation4], 0  ;;  %s558_s30 = smov [#allocation2]   ;;  %s559_s11 = smov [#allocation5]  }
   0x3   :  { %s25_s10 = sshll.u32 %s558_s30, 4  ;;  %s37_s12 = sshll.u32 %s559_s11, 4  ;;  %s26_s10 = int_to_ptr.vmem [resolvable:$true] %s25_s10  ;;  %s38_s12 = int_to_ptr.vmem [resolvable:$true] %s37_s12 }
   0x4   :  { %s486_s15 = scalar_lea.hbm %s699_s1, 128 }
   0x5   :  { %p487_p0 = scmp.ne.s32.totalorder %s699_s1, %s486_s15  ;;  %p490_p1 = scmp.lt.u32.totalorder %s486_s15, %s699_s1 }
   0x7   :  { %p492_p2 = pnand %p490_p1, %p487_p0 }
   0x9   :  { %495 = shalt.err (!%p492_p2)
}
   0xa   :  { %s496_s20 = scalar_lea.vmem %s26_s10, 128  ;;  %p501_p4 = scmp.lt.s32.totalorder %s26_s10, %s26_s10 }
   0xb   :  { %p497_p3 = scmp.ne.s32.totalorder %s26_s10, %s496_s20  ;;  %p502_p5 = scmp.lt.s32.totalorder %s496_s20, %s496_s20 }
   0xd   :  { %p503_p6 = por %p502_p5, %p501_p4 }
   0xf   :  { %p504_p7 = pnand %p503_p6, %p497_p3 }
  0x11   :  { %507 = shalt.err (!%p504_p7)
}
  0x12   :  { %28 = dma.hbm_to_vmem [thread:$0]  %s699_s1, 128, %s26_s10, [#allocation3]  }
  0x13   :  { %s508_s25 = scalar_lea.hbm %s701_s3, 128 }
  0x14   :  { %p509_p8 = scmp.ne.s32.totalorder %s701_s3, %s508_s25  ;;  %p512_p9 = scmp.lt.u32.totalorder %s508_s25, %s701_s3 }
  0x16   :  { %p514_p10 = pnand %p512_p9, %p509_p8 }
  0x18   :  { %517 = shalt.err (!%p514_p10)
}
  0x19   :  { %s518_s30 = scalar_lea.vmem %s38_s12, 128  ;;  %p523_p12 = scmp.lt.s32.totalorder %s38_s12, %s38_s12 }
  0x1a   :  { %p519_p11 = scmp.ne.s32.totalorder %s38_s12, %s518_s30  ;;  %p524_p13 = scmp.lt.s32.totalorder %s518_s30, %s518_s30 }
  0x1c   :  { %p525_p0 = por %p524_p13, %p523_p12 }
  0x1e   :  { %p526_p1 = pnand %p525_p0, %p519_p11 }
  0x20   :  { %529 = shalt.err (!%p526_p1)
}
  0x21   :  { %40 = dma.hbm_to_vmem [thread:$0]  %s701_s3, 128, %s38_s12, [#allocation6]  }
  0x22   :  { %552 = dma.done.wait [#allocation3], 128  }
  0x23   :  { %553 = vsyncadd [#allocation3], 4294967168 }
  0x24   :  { %554 = dma.done.wait [#allocation6], 128  }
  0x25   :  { %555 = vsyncadd [#allocation6], 4294967168  ;;  %v560_v0 = vmov 0.0|0.0   ;;  %v561_v1 = vmov 0.0   ;;  %vm562_vm0 = vmmov 0   ;;  %vm62_vm1 = vcmask 64512  }
  0x26   :  { %463 = vmatprep.subr.bf16.mxu1 %v560_v0  ;;  %429 = vmatprep.subr.mxu0 %v561_v1  ;;  %v58_v2 = vld [vmem:[%s700_s2] sm:$0xff]  ;;  %v59_v3 = vld [vmem:[%s700_s2 + $0x8] sm:$0xff]  ;;  %vm136_vm2 = vcmask 130048   ;;  %v221_v11 = vld [vmem:[%s703_s5 + $0x10] sm:$0xff]  ;;  %vm230_vm3 = vcmask 261120  }
  0x27   :  { %431 = vmatprep.mubr.msk.f32.mxu0 %vm562_vm0, %v561_v1  ;;  %438 = vmatprep.mubr.msk.f32.mxu1 %vm562_vm0, %v561_v1  ;;  %v61_v4 = vld [vmem:[#allocation5] sm:$0xff]  ;;  %v464_v5 = vpack.c.bf16 %v59_v3, %v58_v2  ;;  %v60_v6 = vld [vmem:[#allocation2] sm:$0xff]  ;;  %v222_v12 = vld [vmem:[%s703_s5 + $0x18] sm:$0xff] }
  0x28   :  { %430 = vmatpush3.msra.mxu0 %v61_v4  ;;  %v57_v7 = vld [vmem:[%s698_s0] sm:$0xff]  ;;  %v220_v9 = vld [vmem:[%s703_s5 + $0x8] sm:$0xff]  ;;  %v470_v13 = vpack.c.bf16 %v222_v12, %v221_v11  ;;  %v307_v25 = vld [vmem:[%s705_s7 + $0x10] sm:$0xff] }
  0x29   :  { %432 = vmatmul.mubr.msk.f32.vlgmr.msra.gmra.mrb[0].mxu0 %vm62_vm1, %v60_v6  ;;  %466 = vmatprep.subr.bf16.mxu0 %v560_v0  ;;  %v219_v8 = vld [vmem:[%s703_s5] sm:$0xff]  ;;  %v306_v15 = vld [vmem:[%s705_s7 + $0x8] sm:$0xff]  ;;  %v308_v26 = vld [vmem:[%s705_s7 + $0x18] sm:$0xff] }
  0x2a   :  { %465 = vmatpush3.bf16.msra.mxu1 %v464_v5  ;;  %449 = vmatprep.mubr.msk.f32.mxu0 %vm562_vm0, %v561_v1  ;;  %v467_v10 = vpack.c.bf16 %v220_v9, %v219_v8  ;;  %v305_v14 = vld [vmem:[%s705_s7] sm:$0xff]  ;;  %v476_v27 = vpack.c.bf16 %v308_v26, %v307_v25  ;;  %s563_s7 = smov [#allocation7]  }
  0x2b   :  { %472 = vmatprep.subr.bf16.mxu1 %v560_v0  ;;  %v473_v16 = vpack.c.bf16 %v306_v15, %v305_v14  ;;  %v409_v20 = vld [vmem:[%s702_s4] ss:$0 sm:$0xff]  ;;  %s397_s13 = sshll.u32 %s563_s7, 4  ;;  %s398_s13 = int_to_ptr.vmem [resolvable:$true] %s397_s13 }
  0x2c   :  { %468 = vmatpush3.bf16.msra.mxu0 %v467_v10  ;;  %v410_v28 = vld [vmem:[%s704_s6] ss:$0 sm:$0xff]  ;;  %s530_s6 = scalar_lea.vmem %s398_s13, 128  ;;  %p535_p3 = scmp.lt.s32.totalorder %s398_s13, %s398_s13 }
  0x2d   :  { %439 = vmatmul.mubr.msk.f32.vlgmr.msra.gmra.mrb[0].mxu1 %vm136_vm2, %v57_v7  ;;  %469 = vmatprep.subr.bf16.mxu0 %v560_v0  ;;  %v412_v33 = vld [vmem:[%s706_s8] ss:$0 sm:$0xff]  ;;  %p531_p2 = scmp.ne.s32.totalorder %s398_s13, %s530_s6  ;;  %p536_p4 = scmp.lt.s32.totalorder %s530_s6, %s530_s6 }
  0x2e   :  { %460 = vmatprep.mubr.msk.f32.mxu1 %vm562_vm0, %v561_v1  ;;  %474 = vmatpush3.bf16.msra.mxu1 %v473_v16 }
  0x2f   :  { %475 = vmatprep.subr.bf16.mxu1 %v560_v0  ;;  %p537_p5 = por %p536_p4, %p535_p3 }
  0x30   :  { %471 = vmatpush3.bf16.msra.mxu0 %v470_v13 }
  0x31   :  { %p538_p6 = pnand %p537_p5, %p531_p2 }
  0x32   :  { %477 = vmatpush3.bf16.msra.mxu1 %v476_v27 }
  0xfc   :  { %v132_v17 = vpop.f32.mrb[0].mxu0 }
  0xfd   :  { %v433_v18 = vpop.f32.mrb[1].mxu0 }
 0x100   :  { %v206_v19 = vpop.f32.mrb[0].mxu1 }
 0x101   :  { %v207_v21 = vadd.f32 %v206_v19, %v132_v17  ;;  %v440_v22 = vpop.f32.mrb[1].mxu1 }
 0x103   :  { %v217_v23 = vadd.f32 %v409_v20, %v207_v21 }
 0x105   :  { %v218_v24 = vmax.f32 %v217_v23, 0.0 }
 0x107   :  { %450 = vmatmul.mubr.msk.f32.vlgmr.msra.gmra.mrb[2].mxu0 %vm230_vm3, %v218_v24 }
 0x1da   :  { %v300_v29 = vpop.f32.mrb[2].mxu0 }
 0x1db   :  { %v301_v30 = vadd.f32 %v410_v28, %v300_v29  ;;  %v451_v31 = vpop.f32.mrb[3].mxu0 }
 0x1dd   :  { %v304_v32 = vmax.f32 %v301_v30, 0.0 }
 0x1df   :  { %461 = vmatmul.mubr.msk.f32.vlgmr.msra.gmra.mrb[2].mxu1 %vm230_vm3, %v304_v32 }
 0x2b2   :  { %v385_v34 = vpop.f32.mrb[2].mxu1 }
 0x2b3   :  { %v386_v35 = vadd.f32 %v412_v33, %v385_v34  ;;  %v462_v36 = vpop.f32.mrb[3].mxu1 }
 0x2b5   :  { %484 = vtanh.f32 %v386_v35 }
 0x2bf   :  { %v485_v37 = vpop.eup %484 }
 0x2c0   :  { %390 = vst.msk [vmem:[#allocation7] sm:$0xff] %vm136_vm2, %v485_v37 }
 0x2c1   :  { %541 = shalt.err (!%p538_p6)
}
 0x2c2   :  { %s542_s8 = scalar_lea.hbm %s707_s9, 128 }
 0x2c3   :  { %p543_p7 = scmp.ne.s32.totalorder %s707_s9, %s542_s8  ;;  %p546_p8 = scmp.lt.u32.totalorder %s542_s8, %s707_s9 }
 0x2c5   :  { %p548_p9 = pnand %p546_p8, %p543_p7 }
 0x2c7   :  { %551 = shalt.err (!%p548_p9)
}
 0x2c8   :  { %400 = dma.vmem_to_hbm [thread:$0]  %s398_s13, 128, %s707_s9, [#allocation4]  }
 0x2c9   :  { %556 = dma.done.wait [#allocation4], 128  }
 0x2ca   :  { %557 = vsyncadd [#allocation4], 4294967168 }
 0x2cb   :  { %404 = vsyncpa [#allocation3], 1 }
 0x2cc   :  { %405 = vsyncpa [#allocation6], 1 }
 0x2cd   :  { %406 = vsyncpa [#allocation4], 1 }

</bundles_post_ra>
